<compile_context>
chip_gen: v7x
topology: tpu7x:2x2x1
jax: 0.10.0
libtpu: 0.0.40
codegen_flags: <defaults>
</compile_context>

<pallas_src>
import functools

import jax
import jax.numpy as jnp
from jax import lax
from jax.experimental import pallas as pl
from jax.experimental.pallas import tpu as pltpu

_EPS = 1e-5


def _micro_attention_factor_kernel(
    x_ref, t_ref, logprior_ref,
    w1_ref, b1_ref, g1_ref, be1_ref,
    w2_ref, b2_ref, g2_ref, be2_ref,
    w3d_ref, b3d_ref,
    o_ref,
):
    n, c = x_ref.shape
    inv_c = 1.0 / float(c)
    inv_n = 1.0 / float(n)

    # bf16 copies feed the MXU; f32 copies feed the element-wise (KL / BN) math.
    xb = x_ref[...]                                   # (N, C) bf16
    tb = t_ref[...]                                   # (N, C) bf16
    x = xb.astype(jnp.float32)
    t = tb.astype(jnp.float32)
    logprior = logprior_ref[...]                      # (1, C) f32, log(cls/sum)
    prior = jnp.exp(logprior)                         # computed in-kernel (single EUP row op)

    # ---- teacher softmax: one exp, no log_q materialized ----
    tm = t - jnp.max(t, axis=-1, keepdims=True)
    et = jnp.exp(tm)                                  # single (N, C) exp
    se_t = jnp.sum(et, axis=-1, keepdims=True)        # (N, 1)
    log_se_t = jnp.log(se_t)
    q = et * pl.reciprocal(se_t, approx=True)         # (N, C) teacher probs, EUP recip
    #   sum_c q*log_q = sum_c q*tm - log(se_t)        (since sum_c q = 1)
    s_qlq = jnp.sum(q * tm, axis=-1, keepdims=True) - log_se_t

    # ---- student: one exp serves both the plain and balanced log-softmax ----
    xm = x - jnp.max(x, axis=-1, keepdims=True)
    ex = jnp.exp(xm)                                  # single (N, C) exp
    log_se = jnp.log(jnp.sum(ex, axis=-1, keepdims=True))              # (N, 1)
    log_se_bal = jnp.log(jnp.sum(ex * prior, axis=-1, keepdims=True))  # (N, 1)

    # Row sums shared by both KL variants (row max cancels):
    #   mean_c q*(log_q - log_p)     = (s_qlq - s_qxm + log_se) / C
    #   mean_c q*(log_q - log_p_bal) = (s_qlq - s_qxm - s_qlpr + log_se_bal) / C
    s_qxm = jnp.sum(q * xm, axis=-1, keepdims=True)
    s_qlpr = jnp.sum(q * logprior, axis=-1, keepdims=True)
    loss_vec = (s_qlq - s_qxm + log_se) * inv_c                 # (N, 1)  kd_kl_loss.mean(1)
    bal_vec = (s_qlq - s_qxm - s_qlpr + log_se_bal) * inv_c     # (N, 1)  balanced variant

    # ---- loss_balancer MLP: Linear -> BN -> ReLU -> Linear -> BN -> ReLU -> Linear ----
    # First Linear: VMEM-only lane concat (2C lanes) -> ONE MXU sequence with K = 2C.
    xt = jnp.concatenate([x, t], axis=-1).astype(jnp.bfloat16)          # (N, 2C) bf16
    h = (jnp.dot(xt, w1_ref[...], preferred_element_type=jnp.float32)
         + b1_ref[...])                                                 # (N, 128) f32

    # BatchNorm (training stats), one pass: sum & sumsq, affine folded into mul+add.
    s = jnp.sum(h, axis=0, keepdims=True)
    s2 = jnp.sum(h * h, axis=0, keepdims=True)
    mu = s * inv_n
    var = s2 * inv_n - mu * mu
    scale = lax.rsqrt(var + _EPS) * g1_ref[...]
    shift = be1_ref[...] - mu * scale
    h = jnp.maximum(h * scale + shift, 0.0)                             # padded lanes stay 0

    h = (jnp.dot(h.astype(jnp.bfloat16), w2_ref[...],
                 preferred_element_type=jnp.float32) + b2_ref[...])     # (N, 128)
    s = jnp.sum(h, axis=0, keepdims=True)
    s2 = jnp.sum(h * h, axis=0, keepdims=True)
    mu = s * inv_n
    var = s2 * inv_n - mu * mu
    scale = lax.rsqrt(var + _EPS) * g2_ref[...]
    shift = be2_ref[...] - mu * scale
    h = jnp.maximum(h * scale + shift, 0.0)

    # ---- factors = softmax(h @ W3 + b3, dim=1) with 2 classes -> sigmoid of diff ----
    #   f0 = sigmoid(h @ (w3[:,0]-w3[:,1]) + (b3[0]-b3[1])),  f1 = 1 - f0
    d = jnp.sum(h * w3d_ref[...], axis=-1, keepdims=True) + b3d_ref[0, 0]   # (N, 1)
    f0 = pl.reciprocal(1.0 + jnp.exp(-d), approx=True)                      # EUP exp + recip

    # ---- total_loss = mean_n( loss*f0 + bal*(1-f0) ) ----
    total = bal_vec + (loss_vec - bal_vec) * f0                             # (N, 1)
    o_ref[0, 0] = jnp.sum(total) * inv_n


def micro_attention_factor_forward(logits, teacher_logits, params, cls_num_list):
    """Pure-JAX wrapper: class-prior prep + a single Pallas kernel call."""
    n, c = logits.shape
    cls = jnp.asarray(cls_num_list, dtype=jnp.float32)
    log_prior = jnp.log(cls / jnp.sum(cls)).reshape(1, c).astype(jnp.float32)

    # Ship activations as bf16 (halves HBM read bytes); in production the caller
    # should emit bf16 logits directly so this cast is not an extra HBM pass.
    args = (
        logits.astype(jnp.bfloat16),
        teacher_logits.astype(jnp.bfloat16),
        log_prior,
        params["w1"], params["b1"], params["g1"], params["be1"],
        params["w2"], params["b2"], params["g2"], params["be2"],
        params["w3d"], params["b3d"],
    )

    vmem = pl.BlockSpec(memory_space=pltpu.MemorySpace.VMEM)
    smem = pl.BlockSpec(memory_space=pltpu.MemorySpace.SMEM)
    in_specs = [vmem] * (len(args) - 1) + [smem]     # last arg (b3d scalar) in SMEM

    out = pl.pallas_call(
        _micro_attention_factor_kernel,
        out_shape=jax.ShapeDtypeStruct((1, 1), jnp.float32),
        in_specs=in_specs,
        out_specs=smem,                               # scalar loss via SMEM
        compiler_params=pltpu.CompilerParams(
            # sized against v7x's 64 MiB physical VMEM (safe on v5e/v6e too)
            vmem_limit_bytes=32 * 1024 * 1024,
        ),
    )(*args)
    return out[0, 0]


def init_params(key, num_classes):
    """Deterministic init mirroring nn.Linear / nn.BatchNorm1d shapes, lane-padded.

    Hidden widths 100 and 50 are zero-padded to 128 lanes. Padded weight columns,
    biases, and BN gamma/beta are zero, and the next layer's padded weight rows are
    zero, so padded lanes carry exact zeros through the whole MLP. The final
    Linear(50, 2) + 2-way softmax collapse to a sigmoid of the column difference,
    so only (w3[:,0]-w3[:,1], b3[0]-b3[1]) is shipped.
    """
    c = num_classes
    d_in, h1, h2, d_out = 2 * c, 100, 50, 2
    h1p, h2p = 128, 128
    ks = jax.random.split(key, 8)

    def linear(k, fan_in, fan_out):
        bound = 1.0 / jnp.sqrt(jnp.float32(fan_in))
        w = jax.random.uniform(k, (fan_in, fan_out), jnp.float32, -bound, bound)
        b = jax.random.uniform(jax.random.fold_in(k, 1), (fan_out,), jnp.float32,
                               -bound, bound)
        return w, b

    w1, b1 = linear(ks[0], d_in, h1)     # (2C, 100)
    w2, b2 = linear(ks[1], h1, h2)       # (100, 50)
    w3, b3 = linear(ks[2], h2, d_out)    # (50, 2)

    # BatchNorm affine params (PyTorch default gamma=1, beta=0); tiny deterministic
    # perturbation keeps the test non-trivial.
    g1 = 1.0 + 0.01 * jax.random.normal(ks[3], (h1,), jnp.float32)
    be1 = 0.01 * jax.random.normal(ks[4], (h1,), jnp.float32)
    g2 = 1.0 + 0.01 * jax.random.normal(ks[5], (h2,), jnp.float32)
    be2 = 0.01 * jax.random.normal(ks[6], (h2,), jnp.float32)

    def pad_cols(a, cols):
        return jnp.pad(a, ((0, 0), (0, cols - a.shape[1])))

    def pad_rows(a, rows):
        return jnp.pad(a, ((0, rows - a.shape[0]), (0, 0)))

    def pad_vec(v, width):
        return jnp.pad(v, (0, width - v.shape[0])).reshape(1, width)

    w1p = pad_cols(w1, h1p)                     # (2C, 128)
    w2p = pad_cols(pad_rows(w2, h1p), h2p)      # (128, 128)
    w3p = pad_rows(w3, h2p)                     # (128, 2), padded rows zero

    return dict(
        w1=w1p.astype(jnp.bfloat16),            # (2C, 128) bf16, fused [W1x; W1t]
        b1=pad_vec(b1, h1p),
        g1=pad_vec(g1, h1p),                    # padded lanes: gamma = 0
        be1=pad_vec(be1, h1p),                  # padded lanes: beta  = 0
        w2=w2p.astype(jnp.bfloat16),            # (128, 128) bf16
        b2=pad_vec(b2, h2p),
        g2=pad_vec(g2, h2p),
        be2=pad_vec(be2, h2p),
        w3d=(w3p[:, 0] - w3p[:, 1]).reshape(1, h2p),   # (1, 128) f32
        b3d=(b3[0] - b3[1]).reshape(1, 1),             # (1, 1) f32 (SMEM scalar)
    )


if __name__ == "__main__":
    num_classes = 16
    batch = 8

    key = jax.random.PRNGKey(0)
    k_logits, k_teacher, k_params = jax.random.split(key, 3)

    logits = jax.random.normal(k_logits, (batch, num_classes), jnp.float32)
    teacher_logits = jax.random.normal(k_teacher, (batch, num_classes), jnp.float32)
    params = init_params(k_params, num_classes)

    # deterministic long-tailed class counts (set_cls_num_list equivalent)
    cls_num_list = jnp.exp(-0.2 * jnp.arange(num_classes, dtype=jnp.float32)) * 100.0 + 1.0

    fwd = jax.jit(functools.partial(micro_attention_factor_forward))
    total_loss = fwd(logits, teacher_logits, params, cls_num_list)
    jax.block_until_ready(total_loss)

    assert total_loss.shape == () and bool(jnp.isfinite(total_loss))
    print("KERNEL_OK")
</pallas_src>

<mosaic_0001>
module attributes {stable_mosaic.version = 11 : i64} {
  func.func @_micro_attention_factor_kernel(%arg0: memref<8x16xbf16, #tpu.memory_space<vmem>>, %arg1: memref<8x16xbf16, #tpu.memory_space<vmem>>, %arg2: memref<1x16xf32, #tpu.memory_space<vmem>>, %arg3: memref<32x128xbf16, #tpu.memory_space<vmem>>, %arg4: memref<1x128xf32, #tpu.memory_space<vmem>>, %arg5: memref<1x128xf32, #tpu.memory_space<vmem>>, %arg6: memref<1x128xf32, #tpu.memory_space<vmem>>, %arg7: memref<128x128xbf16, #tpu.memory_space<vmem>>, %arg8: memref<1x128xf32, #tpu.memory_space<vmem>>, %arg9: memref<1x128xf32, #tpu.memory_space<vmem>>, %arg10: memref<1x128xf32, #tpu.memory_space<vmem>>, %arg11: memref<1x128xf32, #tpu.memory_space<vmem>>, %arg12: memref<1x1xf32, #tpu.memory_space<smem>>, %arg13: memref<1x1xf32, #tpu.memory_space<smem>>) attributes {dimension_semantics = [], scalar_prefetch = 0 : i64, scratch_operands = 0 : i64, tpu.core_type = #tpu.core_type<tc>} {
    %c0 = arith.constant 0 : index
    %c0_0 = arith.constant 0 : index
    %0 = vector.load %arg0[%c0, %c0_0] : memref<8x16xbf16, #tpu.memory_space<vmem>>, vector<8x16xbf16>
    %c0_1 = arith.constant 0 : index
    %c0_2 = arith.constant 0 : index
    %1 = vector.load %arg1[%c0_1, %c0_2] : memref<8x16xbf16, #tpu.memory_space<vmem>>, vector<8x16xbf16>
    %2 = arith.extf %0 : vector<8x16xbf16> to vector<8x16xf32>
    %3 = arith.extf %1 : vector<8x16xbf16> to vector<8x16xf32>
    %c0_3 = arith.constant 0 : index
    %c0_4 = arith.constant 0 : index
    %4 = vector.load %arg2[%c0_3, %c0_4] : memref<1x16xf32, #tpu.memory_space<vmem>>, vector<1x16xf32>
    %5 = math.exp %4 : vector<1x16xf32>
    %cst = arith.constant dense<0xFF800000> : vector<8xf32>
    %6 = vector.multi_reduction <maximumf>, %3, %cst [1] : vector<8x16xf32> to vector<8xf32>
    %7 = vector.shape_cast %6 : vector<8xf32> to vector<8x1xf32>
    %8 = vector.broadcast %7 : vector<8x1xf32> to vector<8x16xf32>
    %9 = arith.subf %3, %8 : vector<8x16xf32>
    %10 = math.exp %9 : vector<8x16xf32>
    %cst_5 = arith.constant dense<0.000000e+00> : vector<8xf32>
    %11 = vector.multi_reduction <add>, %10, %cst_5 [1] : vector<8x16xf32> to vector<8xf32>
    %12 = vector.shape_cast %11 : vector<8xf32> to vector<8x1xf32>
    %13 = math.log %12 : vector<8x1xf32>
    %14 = tpu.reciprocal %12 {approx = true} : vector<8x1xf32> -> vector<8x1xf32>
    %15 = vector.broadcast %14 : vector<8x1xf32> to vector<8x16xf32>
    %16 = arith.mulf %10, %15 : vector<8x16xf32>
    %17 = arith.mulf %16, %9 : vector<8x16xf32>
    %cst_6 = arith.constant dense<0.000000e+00> : vector<8xf32>
    %18 = vector.multi_reduction <add>, %17, %cst_6 [1] : vector<8x16xf32> to vector<8xf32>
    %19 = vector.shape_cast %18 : vector<8xf32> to vector<8x1xf32>
    %20 = arith.subf %19, %13 : vector<8x1xf32>
    %cst_7 = arith.constant dense<0xFF800000> : vector<8xf32>
    %21 = vector.multi_reduction <maximumf>, %2, %cst_7 [1] : vector<8x16xf32> to vector<8xf32>
    %22 = vector.shape_cast %21 : vector<8xf32> to vector<8x1xf32>
    %23 = vector.broadcast %22 : vector<8x1xf32> to vector<8x16xf32>
    %24 = arith.subf %2, %23 : vector<8x16xf32>
    %25 = math.exp %24 : vector<8x16xf32>
    %cst_8 = arith.constant dense<0.000000e+00> : vector<8xf32>
    %26 = vector.multi_reduction <add>, %25, %cst_8 [1] : vector<8x16xf32> to vector<8xf32>
    %27 = vector.shape_cast %26 : vector<8xf32> to vector<8x1xf32>
    %28 = math.log %27 : vector<8x1xf32>
    %29 = vector.broadcast %5 : vector<1x16xf32> to vector<8x16xf32>
    %30 = arith.mulf %25, %29 : vector<8x16xf32>
    %cst_9 = arith.constant dense<0.000000e+00> : vector<8xf32>
    %31 = vector.multi_reduction <add>, %30, %cst_9 [1] : vector<8x16xf32> to vector<8xf32>
    %32 = vector.shape_cast %31 : vector<8xf32> to vector<8x1xf32>
    %33 = math.log %32 : vector<8x1xf32>
    %34 = arith.mulf %16, %24 : vector<8x16xf32>
    %cst_10 = arith.constant dense<0.000000e+00> : vector<8xf32>
    %35 = vector.multi_reduction <add>, %34, %cst_10 [1] : vector<8x16xf32> to vector<8xf32>
    %36 = vector.shape_cast %35 : vector<8xf32> to vector<8x1xf32>
    %37 = vector.broadcast %4 : vector<1x16xf32> to vector<8x16xf32>
    %38 = arith.mulf %16, %37 : vector<8x16xf32>
    %cst_11 = arith.constant dense<0.000000e+00> : vector<8xf32>
    %39 = vector.multi_reduction <add>, %38, %cst_11 [1] : vector<8x16xf32> to vector<8xf32>
    %40 = vector.shape_cast %39 : vector<8xf32> to vector<8x1xf32>
    %41 = arith.subf %20, %36 : vector<8x1xf32>
    %42 = arith.addf %41, %28 : vector<8x1xf32>
    %cst_12 = arith.constant 6.250000e-02 : f32
    %43 = vector.broadcast %cst_12 : f32 to vector<8x1xf32>
    %44 = arith.mulf %42, %43 : vector<8x1xf32>
    %45 = arith.subf %20, %36 : vector<8x1xf32>
    %46 = arith.subf %45, %40 : vector<8x1xf32>
    %47 = arith.addf %46, %33 : vector<8x1xf32>
    %cst_13 = arith.constant 6.250000e-02 : f32
    %48 = vector.broadcast %cst_13 : f32 to vector<8x1xf32>
    %49 = arith.mulf %47, %48 : vector<8x1xf32>
    %50 = tpu.concatenate %2, %3 in 1 : vector<8x16xf32>, vector<8x16xf32> -> vector<8x32xf32>
    %51 = arith.truncf %50 : vector<8x32xf32> to vector<8x32xbf16>
    %c0_14 = arith.constant 0 : index
    %c0_15 = arith.constant 0 : index
    %52 = vector.load %arg3[%c0_14, %c0_15] : memref<32x128xbf16, #tpu.memory_space<vmem>>, vector<32x128xbf16>
    %cst_16 = arith.constant dense<0.000000e+00> : vector<8x128xf32>
    %53 = tpu.matmul %51, %52, %cst_16 {dimension_numbers = #tpu.dot_dimension_numbers<[1], [0], [0], [1], [0, 0, 1, 1], [], []>} : vector<8x32xbf16>, vector<32x128xbf16>, vector<8x128xf32> -> vector<8x128xf32>
    %c0_17 = arith.constant 0 : index
    %c0_18 = arith.constant 0 : index
    %54 = vector.load %arg4[%c0_17, %c0_18] : memref<1x128xf32, #tpu.memory_space<vmem>>, vector<1x128xf32>
    %55 = vector.broadcast %54 : vector<1x128xf32> to vector<8x128xf32>
    %56 = arith.addf %53, %55 : vector<8x128xf32>
    %cst_19 = arith.constant dense<0.000000e+00> : vector<128xf32>
    %57 = vector.multi_reduction <add>, %56, %cst_19 [0] : vector<8x128xf32> to vector<128xf32>
    %58 = vector.shape_cast %57 : vector<128xf32> to vector<1x128xf32>
    %59 = arith.mulf %56, %56 : vector<8x128xf32>
    %cst_20 = arith.constant dense<0.000000e+00> : vector<128xf32>
    %60 = vector.multi_reduction <add>, %59, %cst_20 [0] : vector<8x128xf32> to vector<128xf32>
    %61 = vector.shape_cast %60 : vector<128xf32> to vector<1x128xf32>
    %cst_21 = arith.constant 1.250000e-01 : f32
    %62 = vector.broadcast %cst_21 : f32 to vector<1x128xf32>
    %63 = arith.mulf %58, %62 : vector<1x128xf32>
    %cst_22 = arith.constant 1.250000e-01 : f32
    %64 = vector.broadcast %cst_22 : f32 to vector<1x128xf32>
    %65 = arith.mulf %61, %64 : vector<1x128xf32>
    %66 = arith.mulf %63, %63 : vector<1x128xf32>
    %67 = arith.subf %65, %66 : vector<1x128xf32>
    %cst_23 = arith.constant 9.99999974E-6 : f32
    %68 = vector.broadcast %cst_23 : f32 to vector<1x128xf32>
    %69 = arith.addf %67, %68 : vector<1x128xf32>
    %70 = math.rsqrt %69 : vector<1x128xf32>
    %c0_24 = arith.constant 0 : index
    %c0_25 = arith.constant 0 : index
    %71 = vector.load %arg5[%c0_24, %c0_25] : memref<1x128xf32, #tpu.memory_space<vmem>>, vector<1x128xf32>
    %72 = arith.mulf %70, %71 : vector<1x128xf32>
    %c0_26 = arith.constant 0 : index
    %c0_27 = arith.constant 0 : index
    %73 = vector.load %arg6[%c0_26, %c0_27] : memref<1x128xf32, #tpu.memory_space<vmem>>, vector<1x128xf32>
    %74 = arith.mulf %63, %72 : vector<1x128xf32>
    %75 = arith.subf %73, %74 : vector<1x128xf32>
    %76 = vector.broadcast %72 : vector<1x128xf32> to vector<8x128xf32>
    %77 = arith.mulf %56, %76 : vector<8x128xf32>
    %78 = vector.broadcast %75 : vector<1x128xf32> to vector<8x128xf32>
    %79 = arith.addf %77, %78 : vector<8x128xf32>
    %cst_28 = arith.constant 0.000000e+00 : f32
    %80 = vector.broadcast %cst_28 : f32 to vector<8x128xf32>
    %81 = arith.maximumf %79, %80 : vector<8x128xf32>
    %82 = arith.truncf %81 : vector<8x128xf32> to vector<8x128xbf16>
    %c0_29 = arith.constant 0 : index
    %c0_30 = arith.constant 0 : index
    %83 = vector.load %arg7[%c0_29, %c0_30] : memref<128x128xbf16, #tpu.memory_space<vmem>>, vector<128x128xbf16>
    %cst_31 = arith.constant dense<0.000000e+00> : vector<8x128xf32>
    %84 = tpu.matmul %82, %83, %cst_31 {dimension_numbers = #tpu.dot_dimension_numbers<[1], [0], [0], [1], [0, 0, 1, 1], [], []>} : vector<8x128xbf16>, vector<128x128xbf16>, vector<8x128xf32> -> vector<8x128xf32>
    %c0_32 = arith.constant 0 : index
    %c0_33 = arith.constant 0 : index
    %85 = vector.load %arg8[%c0_32, %c0_33] : memref<1x128xf32, #tpu.memory_space<vmem>>, vector<1x128xf32>
    %86 = vector.broadcast %85 : vector<1x128xf32> to vector<8x128xf32>
    %87 = arith.addf %84, %86 : vector<8x128xf32>
    %cst_34 = arith.constant dense<0.000000e+00> : vector<128xf32>
    %88 = vector.multi_reduction <add>, %87, %cst_34 [0] : vector<8x128xf32> to vector<128xf32>
    %89 = vector.shape_cast %88 : vector<128xf32> to vector<1x128xf32>
    %90 = arith.mulf %87, %87 : vector<8x128xf32>
    %cst_35 = arith.constant dense<0.000000e+00> : vector<128xf32>
    %91 = vector.multi_reduction <add>, %90, %cst_35 [0] : vector<8x128xf32> to vector<128xf32>
    %92 = vector.shape_cast %91 : vector<128xf32> to vector<1x128xf32>
    %cst_36 = arith.constant 1.250000e-01 : f32
    %93 = vector.broadcast %cst_36 : f32 to vector<1x128xf32>
    %94 = arith.mulf %89, %93 : vector<1x128xf32>
    %cst_37 = arith.constant 1.250000e-01 : f32
    %95 = vector.broadcast %cst_37 : f32 to vector<1x128xf32>
    %96 = arith.mulf %92, %95 : vector<1x128xf32>
    %97 = arith.mulf %94, %94 : vector<1x128xf32>
    %98 = arith.subf %96, %97 : vector<1x128xf32>
    %cst_38 = arith.constant 9.99999974E-6 : f32
    %99 = vector.broadcast %cst_38 : f32 to vector<1x128xf32>
    %100 = arith.addf %98, %99 : vector<1x128xf32>
    %101 = math.rsqrt %100 : vector<1x128xf32>
    %c0_39 = arith.constant 0 : index
    %c0_40 = arith.constant 0 : index
    %102 = vector.load %arg9[%c0_39, %c0_40] : memref<1x128xf32, #tpu.memory_space<vmem>>, vector<1x128xf32>
    %103 = arith.mulf %101, %102 : vector<1x128xf32>
    %c0_41 = arith.constant 0 : index
    %c0_42 = arith.constant 0 : index
    %104 = vector.load %arg10[%c0_41, %c0_42] : memref<1x128xf32, #tpu.memory_space<vmem>>, vector<1x128xf32>
    %105 = arith.mulf %94, %103 : vector<1x128xf32>
    %106 = arith.subf %104, %105 : vector<1x128xf32>
    %107 = vector.broadcast %103 : vector<1x128xf32> to vector<8x128xf32>
    %108 = arith.mulf %87, %107 : vector<8x128xf32>
    %109 = vector.broadcast %106 : vector<1x128xf32> to vector<8x128xf32>
    %110 = arith.addf %108, %109 : vector<8x128xf32>
    %cst_43 = arith.constant 0.000000e+00 : f32
    %111 = vector.broadcast %cst_43 : f32 to vector<8x128xf32>
    %112 = arith.maximumf %110, %111 : vector<8x128xf32>
    %c0_44 = arith.constant 0 : index
    %c0_45 = arith.constant 0 : index
    %113 = vector.load %arg11[%c0_44, %c0_45] : memref<1x128xf32, #tpu.memory_space<vmem>>, vector<1x128xf32>
    %114 = vector.broadcast %113 : vector<1x128xf32> to vector<8x128xf32>
    %115 = arith.mulf %112, %114 : vector<8x128xf32>
    %cst_46 = arith.constant dense<0.000000e+00> : vector<8xf32>
    %116 = vector.multi_reduction <add>, %115, %cst_46 [1] : vector<8x128xf32> to vector<8xf32>
    %117 = vector.shape_cast %116 : vector<8xf32> to vector<8x1xf32>
    %c0_47 = arith.constant 0 : index
    %c0_48 = arith.constant 0 : index
    %118 = memref.load %arg12[%c0_47, %c0_48] : memref<1x1xf32, #tpu.memory_space<smem>>
    %119 = vector.broadcast %118 : f32 to vector<8x1xf32>
    %120 = arith.addf %117, %119 : vector<8x1xf32>
    %cst_49 = arith.constant 0.000000e+00 : f32
    %121 = vector.broadcast %cst_49 : f32 to vector<8x1xf32>
    %122 = arith.subf %121, %120 : vector<8x1xf32>
    %123 = math.exp %122 : vector<8x1xf32>
    %cst_50 = arith.constant 1.000000e+00 : f32
    %124 = vector.broadcast %cst_50 : f32 to vector<8x1xf32>
    %125 = arith.addf %124, %123 : vector<8x1xf32>
    %126 = tpu.reciprocal %125 {approx = true} : vector<8x1xf32> -> vector<8x1xf32>
    %127 = arith.subf %44, %49 : vector<8x1xf32>
    %128 = arith.mulf %127, %126 : vector<8x1xf32>
    %129 = arith.addf %49, %128 : vector<8x1xf32>
    %130 = vector.shape_cast %129 : vector<8x1xf32> to vector<1x8x1xf32>
    %cst_51 = arith.constant dense<0.000000e+00> : vector<1xf32>
    %131 = vector.multi_reduction <add>, %130, %cst_51 [1, 2] : vector<1x8x1xf32> to vector<1xf32>
    %132 = vector.shape_cast %131 : vector<1xf32> to vector<1x1x1xf32>
    %133 = vector.extract %132[0, 0, 0] : f32 from vector<1x1x1xf32>
    %cst_52 = arith.constant 1.250000e-01 : f32
    %134 = arith.mulf %133, %cst_52 : f32
    %c0_53 = arith.constant 0 : index
    %c0_54 = arith.constant 0 : index
    %135 = memref.load %arg13[%c0_53, %c0_54] : memref<1x1xf32, #tpu.memory_space<smem>>
    memref.store %134, %arg13[%c0_53, %c0_54] : memref<1x1xf32, #tpu.memory_space<smem>>
    return
  }
}

</mosaic_0001>

<bundles_post_ra>
// kernel: micro_attention_factor_forward.1
= control target key start
LH: loop header
LB: loop body
LE: loop exit
PB: predicated region body
PF: predicated region fallthrough
CT: control target
= control target key end

     0   :  { %19 = vsyncpa [#allocation4], 0  ;;  %s805_s0 = inlined_call_operand.vmem [shape: bf16[8,16], index: 0, kind: input, shape index: {}]   ;;  %s806_s1 = inlined_call_operand.vmem [shape: bf16[8,16], index: 1, kind: input, shape index: {}]   ;;  %s807_s2 = inlined_call_operand.vmem [shape: f32[1,16], index: 2, kind: input, shape index: {}]   ;;  %s808_s3 = inlined_call_operand.hbm [shape: bf16[32,128], index: 3, kind: input, shape index: {}]   ;;  %s809_s4 = inlined_call_operand.vmem [shape: f32[1,128], index: 4, kind: input, shape index: {}]   ;;  %s810_s5 = inlined_call_operand.vmem [shape: f32[1,128], index: 5, kind: input, shape index: {}]   ;;  %s811_s6 = inlined_call_operand.vmem [shape: f32[1,128], index: 6, kind: input, shape index: {}]   ;;  %s812_s7 = inlined_call_operand.vmem [shape: bf16[128,128], index: 7, kind: input, shape index: {}]   ;;  %s813_s8 = inlined_call_operand.vmem [shape: f32[1,128], index: 8, kind: input, shape index: {}]   ;;  %s814_s9 = inlined_call_operand.vmem [shape: f32[1,128], index: 9, kind: input, shape index: {}]   ;;  %s815_s10 = inlined_call_operand.hbm [shape: f32[1,128], index: 10, kind: input, shape index: {}]   ;;  %s816_s11 = inlined_call_operand.vmem [shape: f32[1,128], index: 11, kind: input, shape index: {}]   ;;  %s817_s12 = inlined_call_operand.<no memory space> [shape: f32[1,1], index: 12, kind: input, shape index: {}]   ;;  %s818_s13 = inlined_call_operand.hbm [shape: f32[1,1], index: 13, kind: output, shape index: {}]  }
   0x1   :  { %20 = vsyncpa [#allocation7], 0 }
   0x2   :  { %21 = vsyncpa [#allocation5], 0  ;;  %s607_s25 = smov [#allocation3]   ;;  %s547_s29 = scalar_lea.hbm %s808_s3, 256 }
   0x3   :  { %s33_s26 = sshll.u32 %s607_s25, 4  ;;  %p548_p0 = scmp.ne.s32.totalorder %s808_s3, %s547_s29  ;;  %s34_s26 = int_to_ptr.vmem [resolvable:$true] %s33_s26 }
   0x4   :  { %p551_p1 = scmp.lt.u32.totalorder %s547_s29, %s808_s3 }
   0x6   :  { %p553_p2 = pnand %p551_p1, %p548_p0 }
   0x8   :  { %556 = shalt.err (!%p553_p2)
}
   0x9   :  { %s557_s17 = scalar_lea.vmem %s34_s26, 256  ;;  %p562_p4 = scmp.lt.s32.totalorder %s34_s26, %s34_s26 }
   0xa   :  { %p558_p3 = scmp.ne.s32.totalorder %s34_s26, %s557_s17  ;;  %p563_p5 = scmp.lt.s32.totalorder %s557_s17, %s557_s17 }
   0xc   :  { %p564_p6 = por %p563_p5, %p562_p4 }
   0xe   :  { %p565_p7 = pnand %p564_p6, %p558_p3 }
  0x10   :  { %568 = shalt.err (!%p565_p7)
}
  0x11   :  { %s608_s18 = smov 64   ;;  %s609_s19 = smov 4  }
  0x12   :  { %39 = dma.hbm_to_vmem [thread:$0]  %s808_s3, 256, %s34_s26, [#allocation4], %s608_s18, %s608_s18, %s609_s19  }
  0x13   :  { %s610_s22 = smov [#allocation6]   ;;  %s569_s27 = scalar_lea.hbm %s815_s10, 16 }
  0x14   :  { %s58_s23 = sshll.u32 %s610_s22, 4  ;;  %p570_p8 = scmp.ne.s32.totalorder %s815_s10, %s569_s27  ;;  %s59_s23 = int_to_ptr.vmem [resolvable:$true] %s58_s23 }
  0x15   :  { %p573_p9 = scmp.lt.u32.totalorder %s569_s27, %s815_s10 }
  0x17   :  { %p575_p10 = pnand %p573_p9, %p570_p8 }
  0x19   :  { %578 = shalt.err (!%p575_p10)
}
  0x1a   :  { %s579_s15 = scalar_lea.vmem %s59_s23, 16  ;;  %s583_s3 = scalar_lea.vmem %s59_s23, 32 }
  0x1b   :  { %p580_p11 = scmp.ne.s32.totalorder %s59_s23, %s579_s15  ;;  %p584_p12 = scmp.lt.s32.totalorder %s59_s23, %s59_s23 }
  0x1c   :  { %p585_p13 = scmp.lt.s32.totalorder %s583_s3, %s579_s15 }
  0x1e   :  { %p586_p0 = por %p585_p13, %p584_p12 }
  0x20   :  { %p587_p1 = pnand %p586_p0, %p580_p11 }
  0x22   :  { %590 = shalt.err (!%p587_p1)
}
  0x23   :  { %61 = dma.hbm_to_vmem [thread:$0]  %s815_s10, 16, %s59_s23, [#allocation7]  }
  0x24   :  { %601 = dma.done.wait [#allocation4], 256  }
  0x25   :  { %602 = vsyncadd [#allocation4], 4294967040 }
  0x26   :  { %603 = dma.done.wait [#allocation7], 16  }
  0x27   :  { %604 = vsyncadd [#allocation7], 4294967280  ;;  %v611_v0 = vmov 0.0   ;;  %vm612_vm0 = vmmov 0   ;;  %v74_v1 = vld [vmem:[%s806_s1] sm:$0xf]  ;;  %v111_v49 = vlaneseq }
  0x28   :  { %477 = vmatprep.subr.bf16.mxu0 %v611_v0  ;;  %481 = vmatprep.mubr.msk.bf16.mxu0 %vm612_vm0, %v611_v0  ;;  %v76_v2 = vunpack.c.l.bf16 %v74_v1  ;;  %v515_v3 = vld [vmem:[#allocation3] sm:$0xff]   ;;  %s613_s19 = smov 16   ;;  %v516_v4 = vld [vmem:[#allocation3 + $0x8] sm:$0xff]   ;;  %vm80_vm1 = vcmask 130048   ;;  %vm171_vm2 = vcmask 261120   ;;  %v519_v19 = vld [vmem:[%s812_s7 + $0x10] sm:$0xff]  }
  0x29   :  { %485 = vmatprep.subr.bf16.mxu1 %v611_v0  ;;  %501 = vmatprep.mubr.msk.bf16.mxu1 %vm612_vm0, %v611_v0  ;;  %v73_v6 = vld [vmem:[%s805_s0] sm:$0xf]  ;;  %v518_v18 = vld [vmem:[%s812_s7 + $0x8] sm:$0xff]   ;;  %v520_v20 = vld [vmem:[%s812_s7 + $0x18] sm:$0xff]   ;;  %v112_v50 = vshrl.u32 %v111_v49, 7  ;;  %vm422_vm3 = vcmask 7168  }
  0x2a   :  { %143 = vrot.lane.b32.xlu0 %v76_v2, %s613_s19  ;;  %478 = vmatpush3.bf16.msra.mxu0 %v515_v3  ;;  %v81_v5 = vsel %vm80_vm1, %v76_v2, -inf  ;;  %v716_v7 = vunpack.c.l.bf16 %v73_v6  ;;  %v517_v17 = vld [vmem:[%s812_s7] sm:$0xff]   ;;  %v522_v22 = vld [vmem:[%s812_s7 + $0x28] sm:$0xff]   ;;  %v523_v23 = vld [vmem:[%s812_s7 + $0x30] sm:$0xff]   ;;  %s591_s25 = scalar_lea.hbm %s818_s13, 16 }
  0x2b   :  { %479 = vmatprep.subr.bf16.mxu0 %v611_v0  ;;  %486 = vmatpush3.bf16.msra.mxu1 %v517_v17  ;;  %v521_v21 = vld [vmem:[%s812_s7 + $0x20] sm:$0xff]   ;;  %v524_v24 = vld [vmem:[%s812_s7 + $0x38] sm:$0xff]   ;;  %v759_v52 = vsub.s32 0, %v112_v50  ;;  %p592_p2 = scmp.ne.s32.totalorder %s818_s13, %s591_s25  ;;  %p595_p3 = scmp.lt.u32.totalorder %s591_s25, %s818_s13 }
  0x2c   :  { %v99_v8 = vsel %vm80_vm1, %v716_v7, -inf  ;;  %487 = vmatprep.subr.bf16.mxu1 %v611_v0  ;;  %v451_v25 = vld [vmem:[%s809_s4] ss:$0 sm:$0xff] }
  0x2d   :  { %100 = vmax.xlane.f32.xlu1 %v99_v8  ;;  %v234_v51 = vld [vmem:[%s810_s5] sm:$0x1]  ;;  %p597_p4 = pnand %p595_p3, %p592_p2 }
  0x2e   :  { %480 = vmatpush3.bf16.msra.mxu0 %v516_v4  ;;  %v236_v55 = vld [vmem:[%s811_s6] sm:$0x1] }
  0x2f   :  { %488 = vmatpush3.bf16.msra.mxu1 %v518_v18 }
  0x30   :  { %489 = vmatprep.subr.bf16.mxu1 %v611_v0 }
  0x33   :  { %490 = vmatpush3.bf16.msra.mxu1 %v519_v19 }
  0x34   :  { %491 = vmatprep.subr.bf16.mxu1 %v611_v0 }
  0x37   :  { %492 = vmatpush3.bf16.msra.mxu1 %v520_v20 }
  0x38   :  { %493 = vmatprep.subr.bf16.mxu1 %v611_v0 }
  0x3b   :  { %494 = vmatpush3.bf16.msra.mxu1 %v521_v21 }
  0x3c   :  { %495 = vmatprep.subr.bf16.mxu1 %v611_v0 }
  0x3f   :  { %496 = vmatpush3.bf16.msra.mxu1 %v522_v22 }
  0x40   :  { %497 = vmatprep.subr.bf16.mxu1 %v611_v0 }
  0x43   :  { %498 = vmatpush3.bf16.msra.mxu1 %v523_v23 }
  0x44   :  { %499 = vmatprep.subr.bf16.mxu1 %v611_v0  ;;  %v455_v0 = vld [vmem:[%s813_s8] ss:$0 sm:$0xff] }
  0x47   :  { %500 = vmatpush3.bf16.msra.mxu1 %v524_v24 }
  0x49   :  { %82 = vmax.xlane.f32.xlu0 %v81_v5 }
  0x9c   :  { %v144_v9 = vpop.permute.xlu0 %143 }
  0x9d   :  { %v146_v10 = vsel %vm80_vm1, %v716_v7, %v144_v9 }
  0x9e   :  { %v147_v11 = vpack.c.bf16 %v146_v10, %v146_v10 }
  0xa0   :  { %482 = vmatmul.mubr.msk.bf16.vlgmr.msra.gmra.mrb[0].mxu0 %vm171_vm2, %v147_v11 }
  0xd6   :  { %v83_v12 = vpop.xlane.xlu0 %82 }
  0xd7   :  { %v722_v13 = vsub.f32 %v76_v2, %v83_v12 }
  0xd9   :  { %v85_v14 = vmul.f32 1.442695, %v722_v13 }
  0xdb   :  { %525 = vpow2.f32 %v85_v14 }
  0xe5   :  { %v725_v15 = vpop.eup %525 }
  0xe6   :  { %v87_v16 = vsel %vm80_vm1, %v725_v15, 0.0 }
  0xe7   :  { %88 = vadd.xlane.f32.xlu1 %v87_v16 }
 0x173   :  { %v209_v26 = vpop.f32.mrb[0].mxu0 }
 0x174   :  { %v210_v27 = vadd.f32 %v451_v25, %v209_v26  ;;  %v483_v28 = vpop.f32.mrb[1].mxu0 }
 0x175   :  { %v212_v29 = vpop.f32.mrb[2].mxu0 }
 0x176   :  { %v215_v30 = vrot.slane %v210_v27, 4  ;;  %v221_v31 = vmul.f32 %v210_v27, %v210_v27  ;;  %v484_v32 = vpop.f32.mrb[3].mxu0  ;;  %v101_v29 = vpop.xlane.xlu1 %100 }
 0x178   :  { %v216_v33 = vadd.f32 %v215_v30, %v210_v27  ;;  %v222_v34 = vrot.slane %v221_v31, 4  ;;  %v102_v30 = vsub.f32 %v716_v7, %v101_v29 }
 0x17a   :  { %v217_v35 = vrot.slane %v216_v33, 2  ;;  %v223_v36 = vadd.f32 %v222_v34, %v221_v31  ;;  %v383_v31 = vld [vmem:[%s814_s9] sm:$0x1]  ;;  %v103_v32 = vmul.f32 1.442695, %v102_v30 }
 0x17c   :  { %v218_v37 = vadd.f32 %v217_v35, %v216_v33  ;;  %v224_v38 = vrot.slane %v223_v36, 2  ;;  %v89_v35 = vpop.xlane.xlu1 %88 }
 0x17e   :  { %v219_v39 = vrot.slane %v218_v37, 1  ;;  %v225_v40 = vadd.f32 %v224_v38, %v223_v36  ;;  %v385_v36 = vld [vmem:[#allocation6] sm:$0x1] }
 0x180   :  { %v220_v41 = vadd.f32 %v219_v39, %v218_v37  ;;  %v226_v42 = vrot.slane %v225_v40, 1 }
 0x182   :  { %v227_v43 = vadd.f32 %v226_v42, %v225_v40  ;;  %v228_v44 = vmul.f32 0.125, %v220_v41 }
 0x184   :  { %v229_v45 = vmul.f32 0.125, %v227_v43  ;;  %v230_v46 = vmul.f32 %v228_v44, %v228_v44  ;;  %v464_v43 = vld [vmem:[%s816_s11] ss:$0 sm:$0xff] }
 0x186   :  { %v231_v47 = vsub.f32 %v229_v45, %v230_v46 }
 0x188   :  { %v232_v48 = vadd.f32 1e-05, %v231_v47 }
 0x18a   :  { %527 = vrsqrt.f32 %v232_v48 }
 0x194   :  { %v528_v53 = vpop.eup %527 }
 0x195   :  { %v235_v54 = vmul.f32 %v528_v53, %v234_v51 }
 0x197   :  { %v237_v56 = vmul.f32 %v235_v54, %v228_v44  ;;  %v242_v57 = vrot.slane %v235_v54, %v759_v52 }
 0x199   :  { %v238_v58 = vsub.f32 %v236_v55, %v237_v56  ;;  %v243_v59 = vmul.f32 %v242_v57, %v210_v27  ;;  %v77_v27 = vld [vmem:[%s807_s2] sm:$0x1] }
 0x19a   :  { %v78_v28 = vmul.f32 1.442695, %v77_v27  ;;  %v130_v57 = vrot.slane %v77_v27, %v759_v52 }
 0x19b   :  { %v248_v60 = vrot.slane %v238_v58, %v759_v52 }
 0x19d   :  { %v250_v61 = vadd.f32 %v248_v60, %v243_v59 }
 0x19f   :  { %v251_v62 = vmax.f32 %v250_v61, 0.0 }
 0x1a1   :  { %v252_v63 = vpack.c.bf16 %v251_v62, %v251_v62 }
 0x1a3   :  { %502 = vmatmul.mubr.bf16.vlgmr.msra.gmra.mrb[0].mxu1 %v252_v63 }
 0x276   :  { %v358_v1 = vpop.f32.mrb[0].mxu1 }
 0x277   :  { %v359_v2 = vadd.f32 %v455_v0, %v358_v1  ;;  %v503_v3 = vpop.f32.mrb[1].mxu1 }
 0x278   :  { %v361_v4 = vpop.f32.mrb[2].mxu1 }
 0x279   :  { %v364_v5 = vrot.slane %v359_v2, 4  ;;  %v370_v6 = vmul.f32 %v359_v2, %v359_v2  ;;  %v504_v8 = vpop.f32.mrb[3].mxu1 }
 0x27b   :  { %v365_v9 = vadd.f32 %v364_v5, %v359_v2  ;;  %v371_v10 = vrot.slane %v370_v6, 4 }
 0x27d   :  { %v366_v11 = vrot.slane %v365_v9, 2  ;;  %v372_v12 = vadd.f32 %v371_v10, %v370_v6 }
 0x27f   :  { %v367_v14 = vadd.f32 %v366_v11, %v365_v9  ;;  %v373_v16 = vrot.slane %v372_v12, 2 }
 0x281   :  { %v368_v17 = vrot.slane %v367_v14, 1  ;;  %v374_v18 = vadd.f32 %v373_v16, %v372_v12 }
 0x283   :  { %v375_v19 = vrot.slane %v374_v18, 1  ;;  %v369_v20 = vadd.f32 %v368_v17, %v367_v14 }
 0x285   :  { %v376_v21 = vadd.f32 %v375_v19, %v374_v18  ;;  %v377_v22 = vmul.f32 0.125, %v369_v20 }
 0x287   :  { %v378_v23 = vmul.f32 0.125, %v376_v21  ;;  %v379_v24 = vmul.f32 %v377_v22, %v377_v22 }
 0x289   :  { %v380_v25 = vsub.f32 %v378_v23, %v379_v24 }
 0x28b   :  { %v381_v26 = vadd.f32 1e-05, %v380_v25 }
 0x28d   :  { %529 = vrsqrt.f32 %v381_v26 }
 0x28e   :  { %531 = vpow2.f32 %v78_v28 }
 0x28f   :  { %533 = vpow2.f32 %v103_v32 }
 0x290   :  { %535 = vrcp.f32 %v89_v35 }
 0x291   :  { %537 = vlog2.f32 %v89_v35 }
 0x297   :  { %v530_v33 = vpop.eup %529 }
 0x298   :  { %v384_v34 = vmul.f32 %v530_v33, %v383_v31  ;;  %v532_v7 = vpop.eup %531 }
 0x299   :  { %v114_v45 = vrot.slane %v532_v7, %v759_v52  ;;  %v534_v46 = vpop.eup %533 }
 0x29a   :  { %v386_v37 = vmul.f32 %v384_v34, %v377_v22  ;;  %v391_v38 = vrot.slane %v384_v34, %v759_v52  ;;  %v536_v48 = vpop.eup %535  ;;  %v105_v49 = vsel %vm80_vm1, %v534_v46, 0.0 }
 0x29b   :  { %v116_v50 = vmul.f32 %v534_v46, %v114_v45  ;;  %v93_v51 = vmul.f32 %v536_v48, %v725_v15  ;;  %v412_v15 = vstv %s817_s12  ;;  %v538_v1 = vpop.eup %537 }
 0x29c   :  { %v387_v39 = vsub.f32 %v385_v36, %v386_v37  ;;  %v392_v40 = vmul.f32 %v391_v38, %v359_v2  ;;  %v91_v3 = vmul.f32 0.6931472, %v538_v1 }
 0x29d   :  { %v117_v53 = vsel %vm80_vm1, %v116_v50, 0.0  ;;  %v94_v54 = vmul.f32 %v93_v51, %v722_v13  ;;  %v122_v56 = vmul.f32 %v102_v30, %v93_v51  ;;  %v132_v59 = vmul.f32 %v130_v57, %v93_v51 }
 0x29e   :  { %v397_v41 = vrot.slane %v387_v39, %v759_v52 }
 0x29f   :  { %v95_v55 = vsel %vm80_vm1, %v94_v54, 0.0  ;;  %v123_v58 = vsel %vm80_vm1, %v122_v56, 0.0  ;;  %v133_v60 = vsel %vm80_vm1, %v132_v59, 0.0 }
 0x2a0   :  { %v399_v42 = vadd.f32 %v397_v41, %v392_v40 }
 0x2a2   :  { %v400_v44 = vmax.f32 %v399_v42, 0.0 }
 0x2a4   :  { %v408_v47 = vmul.f32 %v464_v43, %v400_v44 }
 0x2a6   :  { %409 = vadd.xlane.f32.xlu1 %v408_v47 }
 0x2aa   :  { %106 = vadd.xlane.f32.xlu1 %v105_v49 }
 0x2ae   :  { %118 = vadd.xlane.f32.xlu1 %v117_v53 }
 0x2b2   :  { %96 = vadd.xlane.f32.xlu1 %v95_v55 }
 0x2b6   :  { %124 = vadd.xlane.f32.xlu1 %v123_v58 }
 0x2ba   :  { %134 = vadd.xlane.f32.xlu1 %v133_v60 }
 0x333   :  { %v410_v61 = vpop.xlane.xlu1 %409 }
 0x334   :  { %v413_v13 = vadd.f32 %v412_v15, %v410_v61 }
 0x336   :  { %v414_v62 = vsub.f32 0.0, %v413_v13 }
 0x337   :  { %v107_v63 = vpop.xlane.xlu1 %106 }
 0x338   :  { %v415_v0 = vmul.f32 1.442695, %v414_v62  ;;  %539 = vlog2.f32 %v107_v63 }
 0x33a   :  { %541 = vpow2.f32 %v415_v0 }
 0x33b   :  { %v119_v52 = vpop.xlane.xlu1 %118 }
 0x33c   :  { %543 = vlog2.f32 %v119_v52 }
 0x33f   :  { %v97_v2 = vpop.xlane.xlu1 %96 }
 0x340   :  { %v98_v8 = vsub.f32 %v97_v2, %v91_v3 }
 0x342   :  { %v540_v4 = vpop.eup %539 }
 0x343   :  { %v125_v5 = vpop.xlane.xlu1 %124  ;;  %v109_v11 = vmul.f32 0.6931472, %v540_v4 }
 0x344   :  { %v542_v6 = vpop.eup %541  ;;  %v136_v12 = vsub.f32 %v98_v8, %v125_v5 }
 0x345   :  { %v417_v9 = vadd.f32 1.0, %v542_v6 }
 0x346   :  { %v544_v10 = vpop.eup %543  ;;  %v137_v18 = vadd.f32 %v136_v12, %v109_v11 }
 0x347   :  { %545 = vrcp.f32 %v417_v9  ;;  %v121_v14 = vmul.f32 0.6931472, %v544_v10  ;;  %v135_v16 = vpop.xlane.xlu1 %134 }
 0x348   :  { %v139_v17 = vsub.f32 %v136_v12, %v135_v16  ;;  %v138_v21 = vmul.f32 0.0625, %v137_v18 }
 0x34a   :  { %v140_v19 = vadd.f32 %v139_v17, %v121_v14 }
 0x34c   :  { %v141_v20 = vmul.f32 0.0625, %v140_v19 }
 0x34e   :  { %v419_v22 = vsub.f32 %v138_v21, %v141_v20 }
 0x351   :  { %v546_v23 = vpop.eup %545 }
 0x352   :  { %v420_v24 = vmul.f32 %v546_v23, %v419_v22 }
 0x354   :  { %v421_v25 = vadd.f32 %v420_v24, %v141_v20 }
 0x356   :  { %v423_v26 = vsel %vm422_vm3, %v421_v25, 0.0 }
 0x357   :  { %424 = vadd.xlane.f32.xlu1 %v423_v26 }
 0x3e4   :  { %v425_v27 = vpop.xlane.xlu1 %424 }
 0x3e5   :  { %v426_v28 = vrot.slane %v425_v27, 4 }
 0x3e7   :  { %v427_v29 = vadd.f32 %v426_v28, %v425_v27 }
 0x3e9   :  { %v428_v30 = vrot.slane %v427_v29, 2 }
 0x3eb   :  { %v429_v31 = vadd.f32 %v428_v30, %v427_v29 }
 0x3ed   :  { %v430_v32 = vrot.slane %v429_v31, 1 }
 0x3ef   :  { %v431_v33 = vadd.f32 %v430_v32, %v429_v31 }
 0x3f1   :  { %505 = vpush %v431_v33 }
 0x422   :  { %s506_s12 = spop %505 }
 0x423   :  { %s433_s22 = smul.f32 0.125, %s506_s12 }
 0x425   :  { %435 = sst [smem:[#allocation8]] %s433_s22 }
 0x426   :  { %600 = shalt.err (!%p597_p4)
}
 0x427   :  { %s614_s14 = smov [#allocation8]  }
 0x428   :  { %443 = dma.smem_to_hbm %s614_s14, 16, %s818_s13, [#allocation5]  }
 0x429   :  { %605 = dma.done.wait [#allocation5], 16  }
 0x42a   :  { %606 = vsyncadd [#allocation5], 4294967280 }
 0x42b   :  { %447 = sfence }
 0x42c   :  { %448 = vsyncpa [#allocation4], 1 }
 0x42d   :  { %449 = vsyncpa [#allocation7], 1 }
 0x42e   :  { %450 = vsyncpa [#allocation5], 1 }

</bundles_post_ra>
